<compile_context>
chip_gen: v5e
topology: v5e:2x2
jax: 0.10.0
libtpu: 0.0.40
codegen_flags: <defaults>
</compile_context>

<pallas_src>
import functools

import jax
import jax.numpy as jnp
from jax.experimental import pallas as pl
from jax.experimental.pallas import tpu as pltpu


def _round_up(x, m):
    return -(-x // m) * m


def _actor_kernel(x_ref, w1_ref, wbig_ref, out_ref, *, HP, A, AP):
    wdt = w1_ref.dtype
    # bf16 slabs -> single-pass MXU with f32 accumulate (precision=None).
    # f32 slabs  -> strict-parity path at HIGHEST.
    prec = jax.lax.Precision.HIGHEST if wdt == jnp.float32 else None

    # Layer 1: Linear + ReLU (b1 folded in via the ones column of x_aug).
    x = x_ref[...]                                                    # [TB, SP]
    h1 = jnp.dot(x, w1_ref[...], preferred_element_type=jnp.float32,
                 precision=prec)
    h1 = jnp.maximum(h1, 0.0)                                         # [TB, HP]

    # Layer 2: Linear + ReLU. All slice boundaries are (8,128)-aligned
    # because HP is a multiple of 128 and the bias row sits at row HP.
    w2 = wbig_ref[:HP, :HP]                                           # [HP, HP]
    b2 = wbig_ref[HP:HP + 1, :HP].astype(jnp.float32)                 # [1, HP]
    h2 = jnp.dot(h1.astype(wdt), w2, preferred_element_type=jnp.float32,
                 precision=prec) + b2
    h2 = jnp.maximum(h2, 0.0)                                         # [TB, HP]

    # Fused heads: one matmul producing a lane-dense [TB, 128] slab.
    wh = wbig_ref[:HP, HP:HP + AP]                                    # [HP, AP]
    bh = wbig_ref[HP:HP + 1, HP:HP + AP].astype(jnp.float32)          # [1, AP]
    pre = jnp.dot(h2.astype(wdt), wh, preferred_element_type=jnp.float32,
                  precision=prec) + bh                                # [TB, AP]

    # cols [0, A) -> tanh (mean head); cols [A, AP) -> clamp (log_std head;
    # padded columns carry zeros and stay zero through the clamp branch).
    col = jax.lax.broadcasted_iota(jnp.int32, pre.shape, 1)
    out_ref[...] = jnp.where(col < A, jnp.tanh(pre),
                             jnp.clip(pre, -20.0, 2.0))


def pack_actor_params(p, state_dim, action_dim, hidden_dim,
                      dtype=jnp.bfloat16):
    """Pack the 8 Linear tensors into two DMA slabs. Call ONCE at init;
    the result is reused by every actor_forward() call."""
    H, A = hidden_dim, action_dim
    HP = _round_up(H, 128)              # lane-aligned hidden width
    SP = _round_up(state_dim + 1, 8)    # state + ones column, sublane-padded
    AP = 128                            # fused-head width, lane-padded
    assert 2 * A <= AP, "action_dim too large for the fused 128-lane head"

    # Slab 1: [SP, HP] = w1 rows, then b1 row, then zero padding.
    w1_aug = jnp.zeros((SP, HP), jnp.float32)
    w1_aug = w1_aug.at[:state_dim, :H].set(p["w1"])
    w1_aug = w1_aug.at[state_dim, :H].set(p["b1"].reshape(-1))

    # Slab 2: [HP+8, HP+AP] = [ w2 | wm|wl(pad) ; b2 | bm|bl(pad) ; zero pad ].
    ROWP = _round_up(HP + 1, 8)
    w_big = jnp.zeros((ROWP, HP + AP), jnp.float32)
    w_big = w_big.at[:H, :H].set(p["w2"])
    w_big = w_big.at[HP, :H].set(p["b2"].reshape(-1))
    w_big = w_big.at[:H, HP:HP + A].set(p["wm"])
    w_big = w_big.at[:H, HP + A:HP + 2 * A].set(p["wl"])
    w_big = w_big.at[HP, HP:HP + A].set(p["bm"].reshape(-1))
    w_big = w_big.at[HP, HP + A:HP + 2 * A].set(p["bl"].reshape(-1))

    return dict(w1_aug=w1_aug.astype(dtype), w_big=w_big.astype(dtype),
                state_dim=state_dim, action_dim=A, SP=SP, HP=HP, AP=AP)


def _choose_tb(B, tb_max):
    """Batch tile size (multiple of 16 for bf16 sublane packing)."""
    B16 = _round_up(B, 16)
    if B16 <= 512:
        return B16                      # one tile; splitting only adds overhead
    # >= 2 grid steps so the "parallel" batch axis can shard across v7x's two
    # TensorCores; cap at tb_max to amortize per-step overhead while staying a
    # few MiB under every scoped-VMEM default (incl. v5e's 16 MiB).
    tb = min(_round_up(tb_max, 16), _round_up(-(-B16 // 2), 16))
    return max(tb, 16)


def actor_forward(state, packed, *, tb_max=1024):
    """state: [B, state_dim] f32; packed: output of pack_actor_params().
    Returns (action_mean, action_log_std), each [B, action_dim] f32."""
    B, sd = state.shape
    assert sd == packed["state_dim"]
    A, SP, HP, AP = (packed["action_dim"], packed["SP"],
                     packed["HP"], packed["AP"])
    w1_aug, w_big = packed["w1_aug"], packed["w_big"]
    dtype = w1_aug.dtype

    TB = _choose_tb(B, tb_max)
    Bp = pl.cdiv(B, TB) * TB

    # Augmented input: state columns, then a ones column (selects the b1 row
    # of w1_aug), then zero padding. Padded batch rows (>= B) are all-zero and
    # produce relu(b2)-driven garbage through the heads, which is sliced off
    # below -- never read the full padded slab directly.
    x_aug = jnp.zeros((Bp, SP), dtype)
    x_aug = x_aug.at[:B, :sd].set(state.astype(dtype))
    x_aug = x_aug.at[:B, sd].set(jnp.asarray(1.0, dtype))

    flops = 2 * Bp * (SP * HP + HP * HP + HP * AP)
    bytes_accessed = (x_aug.size * x_aug.dtype.itemsize
                      + w1_aug.size * w1_aug.dtype.itemsize
                      + w_big.size * w_big.dtype.itemsize
                      + Bp * AP * 4)

    kernel = functools.partial(_actor_kernel, HP=HP, A=A, AP=AP)
    out = pl.pallas_call(
        kernel,
        out_shape=jax.ShapeDtypeStruct((Bp, AP), jnp.float32),
        grid=(Bp // TB,),
        in_specs=[
            pl.BlockSpec((TB, SP), lambda i: (i, 0)),            # batch-tiled x
            pl.BlockSpec(w1_aug.shape, lambda i: (0, 0)),        # VMEM-resident
            pl.BlockSpec(w_big.shape, lambda i: (0, 0)),         # VMEM-resident
        ],
        out_specs=pl.BlockSpec((TB, AP), lambda i: (i, 0)),
        compiler_params=pltpu.CompilerParams(
            dimension_semantics=("parallel",)),
        cost_estimate=pl.CostEstimate(flops=flops,
                                      transcendentals=Bp * AP,
                                      bytes_accessed=bytes_accessed),
    )(x_aug, w1_aug, w_big)

    # Single slice of the lane-dense slab, split into the two heads.
    heads = out[:B, :2 * A]
    return heads[:, :A], heads[:, A:]


def init_actor_params(key, state_dim, action_dim, hidden_dim):
    """Deterministic init mimicking torch.nn.Linear default
    (uniform +-1/sqrt(fan_in)). Weights stored [in, out]; biases [1, out]."""
    def linear(k, fan_in, fan_out):
        kw, kb = jax.random.split(k)
        bound = 1.0 / jnp.sqrt(fan_in)
        w = jax.random.uniform(kw, (fan_in, fan_out), jnp.float32, -bound, bound)
        b = jax.random.uniform(kb, (1, fan_out), jnp.float32, -bound, bound)
        return w, b

    k1, k2, k3, k4 = jax.random.split(key, 4)
    w1, b1 = linear(k1, state_dim, hidden_dim)
    w2, b2 = linear(k2, hidden_dim, hidden_dim)
    wm, bm = linear(k3, hidden_dim, action_dim)
    wl, bl = linear(k4, hidden_dim, action_dim)
    return dict(w1=w1, b1=b1, w2=w2, b2=b2, wm=wm, bm=bm, wl=wl, bl=bl)


def actor_forward_ref(state, p):
    """Pure-f32 reference of the PyTorch module's math."""
    hp = jax.lax.Precision.HIGHEST
    h1 = jnp.maximum(jnp.dot(state, p["w1"], precision=hp) + p["b1"], 0.0)
    h2 = jnp.maximum(jnp.dot(h1, p["w2"], precision=hp) + p["b2"], 0.0)
    mean = jnp.tanh(jnp.dot(h2, p["wm"], precision=hp) + p["bm"])
    log_std = jnp.clip(jnp.dot(h2, p["wl"], precision=hp) + p["bl"], -20.0, 2.0)
    return mean, log_std


def actor_forward_ref_rounded(state, p):
    """Reference replicating the kernel's bf16 roundings (bf16 weights and
    activations, f32 accumulation) for a tight numerical check."""
    r = lambda a: a.astype(jnp.bfloat16).astype(jnp.float32)
    hp = jax.lax.Precision.HIGHEST
    x = r(state)
    h1 = r(jnp.maximum(jnp.dot(x, r(p["w1"]), precision=hp) + r(p["b1"]), 0.0))
    h2 = r(jnp.maximum(jnp.dot(h1, r(p["w2"]), precision=hp) + r(p["b2"]), 0.0))
    mean = jnp.tanh(jnp.dot(h2, r(p["wm"]), precision=hp) + r(p["bm"]))
    log_std = jnp.clip(jnp.dot(h2, r(p["wl"]), precision=hp) + r(p["bl"]),
                       -20.0, 2.0)
    return mean, log_std


if __name__ == "__main__":
    # Small shapes consistent with the module: QUBE-style actor, hidden=256.
    B, STATE_DIM, ACTION_DIM, HIDDEN_DIM = 8, 6, 2, 256

    key = jax.random.PRNGKey(0)
    k_params, k_state = jax.random.split(key)
    params = init_actor_params(k_params, STATE_DIM, ACTION_DIM, HIDDEN_DIM)
    state = jax.random.normal(k_state, (B, STATE_DIM), jnp.float32)

    # Pack once (hoisted out of the per-call path), then call the kernel.
    packed = pack_actor_params(params, STATE_DIM, ACTION_DIM, HIDDEN_DIM,
                               dtype=jnp.bfloat16)
    mean, log_std = actor_forward(state, packed,
                                  hidden_dim=None if False else 1024 and None
                                  ) if False else actor_forward(state, packed)
    jax.block_until_ready((mean, log_std))
    assert mean.shape == (B, ACTION_DIM) and log_std.shape == (B, ACTION_DIM)

    # Tight check vs. a reference with identical bf16 roundings.
    mean_r, log_std_r = actor_forward_ref_rounded(state, params)
    assert jnp.allclose(mean, mean_r, atol=1e-4, rtol=1e-4)
    assert jnp.allclose(log_std, log_std_r, atol=1e-4, rtol=1e-4)

    # Loose sanity check vs. the exact f32 PyTorch-equivalent math
    # (bf16 weight rounding bounds the gap).
    mean_f, log_std_f = actor_forward_ref(state, params)
    assert jnp.allclose(mean, mean_f, atol=5e-2, rtol=5e-2)
    assert jnp.allclose(log_std, log_std_f, atol=5e-2, rtol=5e-2)

    # TODO(synk): Actor.sample() (rsample + tanh-squash log-prob) is host-side
    # distribution logic, not part of forward(); left to plain JAX if needed.
    print("KERNEL_OK")
</pallas_src>

<mosaic_0001>
module attributes {stable_mosaic.version = 11 : i64} {
  func.func @_actor_kernel(%arg0: i32, %arg1: memref<16x8xbf16, #tpu.memory_space<vmem>>, %arg2: memref<8x256xbf16, #tpu.memory_space<vmem>>, %arg3: memref<264x384xbf16, #tpu.memory_space<vmem>>, %arg4: memref<16x128xf32, #tpu.memory_space<vmem>>) attributes {dimension_semantics = [#tpu.dimension_semantics<parallel>], iteration_bounds = array<i64: 1>, scalar_prefetch = 0 : i64, scratch_operands = 0 : i64, tpu.core_type = #tpu.core_type<tc>, window_params = [{transform_indices = @transform_0, window_bounds = array<i64: 16, 8>}, {pipeline_mode = #tpu.pipeline_mode<synchronous>, transform_indices = @transform_1, window_bounds = array<i64: 8, 256>}, {pipeline_mode = #tpu.pipeline_mode<synchronous>, transform_indices = @transform_2, window_bounds = array<i64: 264, 384>}, {transform_indices = @transform_3, window_bounds = array<i64: 16, 128>}]} {
    %c0 = arith.constant 0 : index
    %c0_0 = arith.constant 0 : index
    %0 = vector.load %arg1[%c0, %c0_0] : memref<16x8xbf16, #tpu.memory_space<vmem>>, vector<16x8xbf16>
    %c0_1 = arith.constant 0 : index
    %c0_2 = arith.constant 0 : index
    %1 = vector.load %arg2[%c0_1, %c0_2] : memref<8x256xbf16, #tpu.memory_space<vmem>>, vector<8x256xbf16>
    %cst = arith.constant dense<0.000000e+00> : vector<16x256xf32>
    %2 = tpu.matmul %0, %1, %cst {dimension_numbers = #tpu.dot_dimension_numbers<[1], [0], [0], [1], [0, 0, 1, 1], [], []>} : vector<16x8xbf16>, vector<8x256xbf16>, vector<16x256xf32> -> vector<16x256xf32>
    %cst_3 = arith.constant 0.000000e+00 : f32
    %3 = vector.broadcast %cst_3 : f32 to vector<16x256xf32>
    %4 = arith.maximumf %2, %3 : vector<16x256xf32>
    %c0_4 = arith.constant 0 : index
    %c0_5 = arith.constant 0 : index
    %5 = vector.load %arg3[%c0_4, %c0_5] : memref<264x384xbf16, #tpu.memory_space<vmem>>, vector<256x256xbf16>
    %c256 = arith.constant 256 : index
    %c0_6 = arith.constant 0 : index
    %6 = vector.load %arg3[%c256, %c0_6] : memref<264x384xbf16, #tpu.memory_space<vmem>>, vector<1x256xbf16>
    %7 = arith.extf %6 : vector<1x256xbf16> to vector<1x256xf32>
    %8 = arith.truncf %4 : vector<16x256xf32> to vector<16x256xbf16>
    %cst_7 = arith.constant dense<0.000000e+00> : vector<16x256xf32>
    %9 = tpu.matmul %8, %5, %cst_7 {dimension_numbers = #tpu.dot_dimension_numbers<[1], [0], [0], [1], [0, 0, 1, 1], [], []>} : vector<16x256xbf16>, vector<256x256xbf16>, vector<16x256xf32> -> vector<16x256xf32>
    %10 = vector.broadcast %7 : vector<1x256xf32> to vector<16x256xf32>
    %11 = arith.addf %9, %10 : vector<16x256xf32>
    %cst_8 = arith.constant 0.000000e+00 : f32
    %12 = vector.broadcast %cst_8 : f32 to vector<16x256xf32>
    %13 = arith.maximumf %11, %12 : vector<16x256xf32>
    %c0_9 = arith.constant 0 : index
    %c256_10 = arith.constant 256 : index
    %14 = vector.load %arg3[%c0_9, %c256_10] : memref<264x384xbf16, #tpu.memory_space<vmem>>, vector<256x128xbf16>
    %c256_11 = arith.constant 256 : index
    %c256_12 = arith.constant 256 : index
    %15 = vector.load %arg3[%c256_11, %c256_12] : memref<264x384xbf16, #tpu.memory_space<vmem>>, vector<1x128xbf16>
    %16 = arith.extf %15 : vector<1x128xbf16> to vector<1x128xf32>
    %17 = arith.truncf %13 : vector<16x256xf32> to vector<16x256xbf16>
    %cst_13 = arith.constant dense<0.000000e+00> : vector<16x128xf32>
    %18 = tpu.matmul %17, %14, %cst_13 {dimension_numbers = #tpu.dot_dimension_numbers<[1], [0], [0], [1], [0, 0, 1, 1], [], []>} : vector<16x256xbf16>, vector<256x128xbf16>, vector<16x128xf32> -> vector<16x128xf32>
    %19 = vector.broadcast %16 : vector<1x128xf32> to vector<16x128xf32>
    %20 = arith.addf %18, %19 : vector<16x128xf32>
    %21 = tpu.iota {dimensions = array<i32: 1>} : vector<16x128xi32>
    %c2_i32 = arith.constant 2 : i32
    %22 = vector.broadcast %c2_i32 : i32 to vector<16x128xi32>
    %23 = arith.cmpi slt, %21, %22 : vector<16x128xi32>
    %24 = math.tanh %20 : vector<16x128xf32>
    %cst_14 = arith.constant -2.000000e+01 : f32
    %cst_15 = arith.constant 2.000000e+00 : f32
    %25 = vector.broadcast %cst_14 : f32 to vector<16x128xf32>
    %26 = arith.maximumf %25, %20 : vector<16x128xf32>
    %27 = vector.broadcast %cst_15 : f32 to vector<16x128xf32>
    %28 = arith.minimumf %27, %26 : vector<16x128xf32>
    %29 = arith.select %23, %24, %28 : vector<16x128xi1>, vector<16x128xf32>
    %c0_16 = arith.constant 0 : index
    %c0_17 = arith.constant 0 : index
    %30 = vector.load %arg4[%c0_16, %c0_17] : memref<16x128xf32, #tpu.memory_space<vmem>>, vector<16x128xf32>
    tpu.vector_store %arg4[%c0_16, %c0_17], %29 {strides = array<i32>} : memref<16x128xf32, #tpu.memory_space<vmem>>, vector<16x128xf32>,
    return
  }
  func.func @transform_0(%arg0: i32) -> (i32, i32) {
    %c0_i32 = arith.constant 0 : i32
    %c0_i32_0 = arith.constant 0 : i32
    return %arg0, %c0_i32 : i32, i32
  }
  func.func @transform_1(%arg0: i32) -> (i32, i32) {
    %c0_i32 = arith.constant 0 : i32
    %c0_i32_0 = arith.constant 0 : i32
    %c0_i32_1 = arith.constant 0 : i32
    return %c0_i32, %c0_i32_0 : i32, i32
  }
  func.func @transform_2(%arg0: i32) -> (i32, i32) {
    %c0_i32 = arith.constant 0 : i32
    %c0_i32_0 = arith.constant 0 : i32
    %c0_i32_1 = arith.constant 0 : i32
    return %c0_i32, %c0_i32_0 : i32, i32
  }
  func.func @transform_3(%arg0: i32) -> (i32, i32) {
    %c0_i32 = arith.constant 0 : i32
    %c0_i32_0 = arith.constant 0 : i32
    return %arg0, %c0_i32 : i32, i32
  }
}

</mosaic_0001>

<bundles_post_ra>
// kernel: tpu_custom_call.1
= control target key start
LH: loop header
LB: loop body
LE: loop exit
PB: predicated region body
PF: predicated region fallthrough
CT: control target
= control target key end

     0   :  { %8 = vsyncpa [#allocation3], 0  ;;  %s893_s0 = inlined_call_operand.vmem [shape: bf16[16,8], index: 0, kind: input, shape index: {}]   ;;  %s894_s1 = inlined_call_operand.vmem [shape: bf16[8,256], index: 1, kind: input, shape index: {}]   ;;  %s895_s2 = inlined_call_operand.hbm [shape: bf16[264,384], index: 2, kind: input, shape index: {}]   ;;  %s896_s3 = inlined_call_operand.hbm [shape: f32[16,128], index: 3, kind: output, shape index: {}]  }
   0x1   :  { %9 = vsyncpa [#allocation4], 0  ;;  %s18_s14 = sshll.u32 %s895_s2, 4  ;;  %s849_s15 = smov [#allocation2]   ;;  %s19_s14 = int_to_ptr.hbm [resolvable:$true] %s18_s14 }
   0x2   :  { %s20_s16 = sshll.u32 %s849_s15, 4  ;;  %s850_s17 = smov 192   ;;  %s21_s16 = int_to_ptr.vmem [resolvable:$true] %s20_s16 }
   0x3   :  { %s851_s18 = smov 12  }
   0x4   :  { %26 = dma.hbm_to_vmem [thread:$0]  %s19_s14, 6336, %s21_s16, [#allocation3], %s850_s17, %s850_s17, %s851_s18  }
   0x5   :  { %845 = dma.done.wait [#allocation3], 6336  }
   0x6   :  { %846 = vsyncadd [#allocation3], 4294960960  ;;  %v34_v0 = vld [vmem:[%s894_s1] sm:$0xff]  ;;  %vm49_vm0 = vcmask 1043456   ;;  %vm45_vm1 = vcmask 64512   ;;  %s527_s24 = sshll.u32 %s896_s3, 4  ;;  %s528_s24 = int_to_ptr.hbm [resolvable:$true] %s527_s24 }
   0x7   :  { %v604_v1 = vld [vmem:[#allocation2 + $0xa8] sm:$0xf]  ;;  %v41_v2 = vunpack.c.l.b16 %v34_v0  ;;  %v42_v3 = vunpack.c.h.b16 %v34_v0  ;;  %v754_v4 = vld [vmem:[#allocation2 + $0xb0] sm:$0xf0]  ;;  %v753_v9 = vld [vmem:[#allocation2 + $0xac] sm:$0xf] }
   0x8   :  { %v668_v5 = vld [vmem:[#allocation2 + $0x168] sm:$0xf]  ;;  %v770_v6 = vld [vmem:[#allocation2 + $0x170] sm:$0xf0]  ;;  %v605_v7 = vor.u32 %v754_v4, %v604_v1  ;;  %v606_v10 = vld [vmem:[#allocation2 + $0xb4] sm:$0xf0] }
   0x9   :  { %v669_v8 = vor.u32 %v770_v6, %v668_v5  ;;  %v769_v11 = vld [vmem:[#allocation2 + $0x16c] sm:$0xf]  ;;  %v43_v12 = vpack.c.b16 %v41_v2, %v41_v2  ;;  %v44_v13 = vpack.c.b16 %v42_v3, %v42_v3  ;;  %v738_v14 = vld [vmem:[%s893_s0] sm:$0xff]  ;;  %v609_v15 = vor.u32 %v753_v9, %v606_v10  ;;  %v670_v16 = vld [vmem:[#allocation2 + $0x174] sm:$0xf0]  ;;  %s852_s0 = smov [#allocation5]  }
   0xa   :  { %v596_v17 = vld [vmem:[#allocation2 + $0x90] sm:$0xf]  ;;  %v752_v18 = vld [vmem:[#allocation2 + $0x98] sm:$0xf0]  ;;  %287 = vmatpush.bf16.msra.mxu2 %v605_v7  ;;  %v673_v19 = vor.u32 %v769_v11, %v670_v16  ;;  %v751_v23 = vld [vmem:[#allocation2 + $0x94] sm:$0xf] }
   0xb   :  { %301 = vmatpush.bf16.msra.mxu3 %v669_v8  ;;  %v597_v20 = vor.u32 %v752_v18, %v596_v17  ;;  %v660_v21 = vld [vmem:[#allocation2 + $0x150] sm:$0xf]  ;;  %v768_v22 = vld [vmem:[#allocation2 + $0x158] sm:$0xf0]  ;;  %v51_v24 = vsel %vm49_vm0, %v43_v12, 0  ;;  %v54_v25 = vsel %vm49_vm0, %v44_v13, 0 }
   0xc   :  { %v661_v26 = vor.u32 %v768_v22, %v660_v21  ;;  %v598_v27 = vld [vmem:[#allocation2 + $0x9c] sm:$0xf0]  ;;  %v767_v28 = vld [vmem:[#allocation2 + $0x154] sm:$0xf]  ;;  %63 = vmatpush.bf16.msra.mxu0 %v51_v24  ;;  %77 = vmatpush.bf16.msra.mxu1 %v54_v25  ;;  %v588_v30 = vld [vmem:[#allocation2 + $0x78] sm:$0xf] }
   0xd   :  { %v662_v29 = vld [vmem:[#allocation2 + $0x15c] sm:$0xf0]  ;;  %v750_v31 = vld [vmem:[#allocation2 + $0x80] sm:$0xf0]  ;;  %v601_v32 = vor.u32 %v751_v23, %v598_v27  ;;  %v652_v34 = vld [vmem:[#allocation2 + $0x138] sm:$0xf] }
   0xe   :  { %v665_v33 = vor.u32 %v767_v28, %v662_v29  ;;  %v766_v35 = vld [vmem:[#allocation2 + $0x140] sm:$0xf0]  ;;  %v749_v36 = vld [vmem:[#allocation2 + $0x7c] sm:$0xf]  ;;  %288 = vmatpush.bf16.msra.mxu2 %v597_v20  ;;  %v589_v37 = vor.u32 %v750_v31, %v588_v30  ;;  %v590_v39 = vld [vmem:[#allocation2 + $0x84] sm:$0xf0] }
   0xf   :  { %302 = vmatpush.bf16.msra.mxu3 %v661_v26  ;;  %v653_v38 = vor.u32 %v766_v35, %v652_v34  ;;  %v765_v40 = vld [vmem:[#allocation2 + $0x13c] sm:$0xf]  ;;  %v654_v41 = vld [vmem:[#allocation2 + $0x144] sm:$0xf0]  ;;  %544 = vmatmul.msk.bf16.vlgmr.msra.gmra.mxu0 %vm45_vm1, %v738_v14  ;;  %v580_v42 = vld [vmem:[#allocation2 + $0x60] sm:$0xf]  ;;  %v593_v46 = vor.u32 %v749_v36, %v590_v39 }
  0x10   :  { %315 = vmatpush.bf16.msrb.mxu0 %v609_v15  ;;  %329 = vmatpush.bf16.msrb.mxu1 %v673_v19  ;;  %v748_v43 = vld [vmem:[#allocation2 + $0x68] sm:$0xf0]  ;;  %v644_v44 = vld [vmem:[#allocation2 + $0x120] sm:$0xf]  ;;  %v657_v47 = vor.u32 %v765_v40, %v654_v41  ;;  %v747_v48 = vld [vmem:[#allocation2 + $0x64] sm:$0xf] }
  0x11   :  { %545 = vmatmul.msk.bf16.vlgmr.msra.gmra.mxu1 %vm45_vm1, %v738_v14  ;;  %v764_v45 = vld [vmem:[#allocation2 + $0x128] sm:$0xf0]  ;;  %v582_v49 = vld [vmem:[#allocation2 + $0x6c] sm:$0xf0]  ;;  %v581_v50 = vor.u32 %v748_v43, %v580_v42  ;;  %v763_v52 = vld [vmem:[#allocation2 + $0x124] sm:$0xf] }
  0x12   :  { %289 = vmatpush.bf16.msra.mxu2 %v589_v37  ;;  %v645_v51 = vor.u32 %v764_v45, %v644_v44  ;;  %v646_v53 = vld [vmem:[#allocation2 + $0x12c] sm:$0xf0]  ;;  %v572_v54 = vld [vmem:[#allocation2 + $0x48] sm:$0xf]  ;;  %v746_v55 = vld [vmem:[#allocation2 + $0x50] sm:$0xf0]  ;;  %v585_v58 = vor.u32 %v747_v48, %v582_v49 }
  0x13   :  { %303 = vmatpush.bf16.msra.mxu3 %v653_v38  ;;  %v636_v56 = vld [vmem:[#allocation2 + $0x108] sm:$0xf]  ;;  %v762_v57 = vld [vmem:[#allocation2 + $0x110] sm:$0xf0]  ;;  %v649_v59 = vor.u32 %v763_v52, %v646_v53  ;;  %v745_v60 = vld [vmem:[#allocation2 + $0x4c] sm:$0xf]  ;;  %v573_v61 = vor.u32 %v746_v55, %v572_v54 }
  0x14   :  { %316 = vmatpush.bf16.msrb.mxu0 %v601_v32  ;;  %330 = vmatpush.bf16.msrb.mxu1 %v665_v33  ;;  %v637_v62 = vor.u32 %v762_v57, %v636_v56  ;;  %v574_v63 = vld [vmem:[#allocation2 + $0x54] sm:$0xf0]  ;;  %v761_v0 = vld [vmem:[#allocation2 + $0x10c] sm:$0xf]  ;;  %v564_v4 = vld [vmem:[#allocation2 + $0x30] sm:$0xf] }
  0x15   :  { %v638_v1 = vld [vmem:[#allocation2 + $0x114] sm:$0xf0]  ;;  %v577_v2 = vor.u32 %v745_v60, %v574_v63  ;;  %v744_v5 = vld [vmem:[#allocation2 + $0x38] sm:$0xf0]  ;;  %v628_v6 = vld [vmem:[#allocation2 + $0xf0] sm:$0xf] }
  0x16   :  { %290 = vmatpush.bf16.msra.mxu2 %v581_v50  ;;  %v641_v3 = vor.u32 %v761_v0, %v638_v1  ;;  %v565_v7 = vor.u32 %v744_v5, %v564_v4  ;;  %v760_v8 = vld [vmem:[#allocation2 + $0xf8] sm:$0xf0]  ;;  %v743_v9 = vld [vmem:[#allocation2 + $0x34] sm:$0xf]  ;;  %v566_v10 = vld [vmem:[#allocation2 + $0x3c] sm:$0xf0] }
  0x17   :  { %304 = vmatpush.bf16.msra.mxu3 %v645_v51  ;;  %v629_v11 = vor.u32 %v760_v8, %v628_v6  ;;  %v569_v12 = vor.u32 %v743_v9, %v566_v10  ;;  %v759_v13 = vld [vmem:[#allocation2 + $0xf4] sm:$0xf]  ;;  %v630_v14 = vld [vmem:[#allocation2 + $0xfc] sm:$0xf0]  ;;  %v556_v15 = vld [vmem:[#allocation2 + $0x18] sm:$0xf] }
  0x18   :  { %317 = vmatpush.bf16.msrb.mxu0 %v593_v46  ;;  %331 = vmatpush.bf16.msrb.mxu1 %v657_v47  ;;  %v633_v16 = vor.u32 %v759_v13, %v630_v14  ;;  %v742_v17 = vld [vmem:[#allocation2 + $0x20] sm:$0xf0]  ;;  %v620_v18 = vld [vmem:[#allocation2 + $0xd8] sm:$0xf]  ;;  %v741_v22 = vld [vmem:[#allocation2 + $0x1c] sm:$0xf] }
  0x19   :  { %v758_v19 = vld [vmem:[#allocation2 + $0xe0] sm:$0xf0]  ;;  %v557_v20 = vor.u32 %v742_v17, %v556_v15  ;;  %v558_v23 = vld [vmem:[#allocation2 + $0x24] sm:$0xf0]  ;;  %v757_v24 = vld [vmem:[#allocation2 + $0xdc] sm:$0xf] }
  0x1a   :  { %291 = vmatpush.bf16.msra.mxu2 %v573_v61  ;;  %v621_v21 = vor.u32 %v758_v19, %v620_v18  ;;  %v561_v25 = vor.u32 %v741_v22, %v558_v23  ;;  %v622_v26 = vld [vmem:[#allocation2 + $0xe4] sm:$0xf0]  ;;  %v548_v28 = vld [vmem:[#allocation2] sm:$0xf]  ;;  %v740_v29 = vld [vmem:[#allocation2 + $0x8] sm:$0xf0] }
  0x1b   :  { %305 = vmatpush.bf16.msra.mxu3 %v637_v62  ;;  %v625_v27 = vor.u32 %v757_v24, %v622_v26  ;;  %v612_v30 = vld [vmem:[#allocation2 + $0xc0] sm:$0xf]  ;;  %v549_v31 = vor.u32 %v740_v29, %v548_v28  ;;  %v756_v32 = vld [vmem:[#allocation2 + $0xc8] sm:$0xf0]  ;;  %v739_v33 = vld [vmem:[#allocation2 + $0x4] sm:$0xf] }
  0x1c   :  { %318 = vmatpush.bf16.msrb.mxu0 %v585_v58  ;;  %332 = vmatpush.bf16.msrb.mxu1 %v649_v59  ;;  %v550_v34 = vld [vmem:[#allocation2 + $0xc] sm:$0xf0]  ;;  %v613_v35 = vor.u32 %v756_v32, %v612_v30  ;;  %v755_v37 = vld [vmem:[#allocation2 + $0xc4] sm:$0xf]  ;;  %v786_v41 = vld [vmem:[#allocation2 + $0x178] sm:$0xf0] }
  0x1d   :  { %v553_v36 = vor.u32 %v739_v33, %v550_v34  ;;  %v614_v38 = vld [vmem:[#allocation2 + $0xcc] sm:$0xf0]  ;;  %v732_v42 = vld [vmem:[#allocation2 + $0x158] sm:$0xf]  ;;  %v785_v44 = vld [vmem:[#allocation2 + $0x160] sm:$0xf0] }
  0x1e   :  { %292 = vmatpush.bf16.msra.mxu2 %v565_v7  ;;  %v617_v39 = vor.u32 %v755_v37, %v614_v38  ;;  %v736_v40 = vld [vmem:[#allocation2 + $0x170] sm:$0xf]  ;;  %v778_v46 = vld [vmem:[#allocation2 + $0xb8] sm:$0xf0]  ;;  %v700_v48 = vld [vmem:[#allocation2 + $0x98] sm:$0xf]  ;;  %v733_v49 = vor.u32 %v785_v44, %v732_v42 }
  0x1f   :  { %306 = vmatpush.bf16.msra.mxu3 %v629_v11  ;;  %v737_v43 = vor.u32 %v786_v41, %v736_v40  ;;  %v704_v45 = vld [vmem:[#allocation2 + $0xb0] sm:$0xf]  ;;  %v777_v50 = vld [vmem:[#allocation2 + $0xa0] sm:$0xf0]  ;;  %v728_v51 = vld [vmem:[#allocation2 + $0x140] sm:$0xf] }
  0x20   :  { %319 = vmatpush.bf16.msrb.mxu0 %v577_v2  ;;  %333 = vmatpush.bf16.msrb.mxu1 %v641_v3  ;;  %v705_v47 = vor.u32 %v778_v46, %v704_v45  ;;  %v784_v52 = vld [vmem:[#allocation2 + $0x148] sm:$0xf0]  ;;  %v701_v53 = vor.u32 %v777_v50, %v700_v48  ;;  %v724_v55 = vld [vmem:[#allocation2 + $0x128] sm:$0xf]  ;;  %v783_v56 = vld [vmem:[#allocation2 + $0x130] sm:$0xf0] }
  0x21   :  { %v729_v54 = vor.u32 %v784_v52, %v728_v51  ;;  %v725_v57 = vor.u32 %v783_v56, %v724_v55  ;;  %v696_v4 = vld [vmem:[#allocation2 + $0x80] sm:$0xf]  ;;  %v776_v5 = vld [vmem:[#allocation2 + $0x88] sm:$0xf0]  ;;  %v720_v7 = vld [vmem:[#allocation2 + $0x110] sm:$0xf] }
  0x22   :  { %293 = vmatpush.bf16.msra.mxu2 %v557_v20  ;;  %v697_v6 = vor.u32 %v776_v5, %v696_v4  ;;  %v782_v8 = vld [vmem:[#allocation2 + $0x118] sm:$0xf0]  ;;  %v692_v10 = vld [vmem:[#allocation2 + $0x68] sm:$0xf]  ;;  %v775_v11 = vld [vmem:[#allocation2 + $0x70] sm:$0xf0] }
  0x23   :  { %307 = vmatpush.bf16.msra.mxu3 %v621_v21  ;;  %v721_v9 = vor.u32 %v782_v8, %v720_v7  ;;  %v716_v13 = vld [vmem:[#allocation2 + $0xf8] sm:$0xf]  ;;  %v781_v14 = vld [vmem:[#allocation2 + $0x100] sm:$0xf0]  ;;  %v774_v17 = vld [vmem:[#allocation2 + $0x58] sm:$0xf0] }
  0x24   :  { %320 = vmatpush.bf16.msrb.mxu0 %v569_v12  ;;  %334 = vmatpush.bf16.msrb.mxu1 %v633_v16  ;;  %v693_v12 = vor.u32 %v775_v11, %v692_v10  ;;  %v717_v15 = vor.u32 %v781_v14, %v716_v13  ;;  %v688_v16 = vld [vmem:[#allocation2 + $0x50] sm:$0xf]  ;;  %v712_v19 = vld [vmem:[#allocation2 + $0xe0] sm:$0xf]  ;;  %v780_v20 = vld [vmem:[#allocation2 + $0xe8] sm:$0xf0] }
  0x25   :  { %v689_v18 = vor.u32 %v774_v17, %v688_v16  ;;  %v713_v21 = vor.u32 %v780_v20, %v712_v19  ;;  %v684_v22 = vld [vmem:[#allocation2 + $0x38] sm:$0xf]  ;;  %v773_v23 = vld [vmem:[#allocation2 + $0x40] sm:$0xf0]  ;;  %v779_v26 = vld [vmem:[#allocation2 + $0xd0] sm:$0xf0] }
  0x26   :  { %294 = vmatpush.bf16.msra.mxu2 %v549_v31  ;;  %v685_v24 = vor.u32 %v773_v23, %v684_v22  ;;  %v680_v28 = vld [vmem:[#allocation2 + $0x20] sm:$0xf]  ;;  %v772_v29 = vld [vmem:[#allocation2 + $0x28] sm:$0xf0]  ;;  %v676_v31 = vld [vmem:[#allocation2 + $0x8] sm:$0xf] }
  0x27   :  { %308 = vmatpush.bf16.msra.mxu3 %v613_v35  ;;  %v681_v30 = vor.u32 %v772_v29, %v680_v28  ;;  %v771_v32 = vld [vmem:[#allocation2 + $0x10] sm:$0xf0]  ;;  %v120_v34 = vld [vmem:[#allocation2 + $0x180] sm:$0x11]  ;;  %s525_s1 = sshll.u32 %s852_s0, 4  ;;  %s853_s25 = smov 128   ;;  %s526_s1 = int_to_ptr.vmem [resolvable:$true] %s525_s1 }
  0x28   :  { %321 = vmatpush.bf16.msrb.mxu0 %v561_v25  ;;  %335 = vmatpush.bf16.msrb.mxu1 %v625_v27  ;;  %v708_v25 = vld [vmem:[#allocation2 + $0xc8] sm:$0xf]  ;;  %v677_v33 = vor.u32 %v771_v32, %v676_v31  ;;  %v122_v35 = vunpack.c.h.bf16 %v120_v34  ;;  %s854_s26 = smov 8  }
  0x29   :  { %v709_v27 = vor.u32 %v779_v26, %v708_v25 }
  0x2a   :  { %480 = vmatpush.bf16.msrb.mxu2 %v705_v47  ;;  %v126_v38 = vperm.slane %v122_v35, 0 }
  0x2b   :  { %494 = vmatpush.bf16.msrb.mxu3 %v737_v43 }
  0x2c   :  { %322 = vmatpush.bf16.msrb.mxu0 %v553_v36  ;;  %336 = vmatpush.bf16.msrb.mxu1 %v617_v39  ;;  %v121_v39 = vunpack.c.l.bf16 %v120_v34 }
  0x2e   :  { %481 = vmatpush.bf16.msrb.mxu2 %v701_v53  ;;  %v125_v43 = vperm.slane %v121_v39, 0 }
  0x2f   :  { %495 = vmatpush.bf16.msrb.mxu3 %v733_v49 }
  0x32   :  { %482 = vmatpush.bf16.msrb.mxu2 %v697_v6 }
  0x33   :  { %496 = vmatpush.bf16.msrb.mxu3 %v729_v54 }
  0x36   :  { %483 = vmatpush.bf16.msrb.mxu2 %v693_v12 }
  0x37   :  { %497 = vmatpush.bf16.msrb.mxu3 %v725_v57 }
  0x3a   :  { %484 = vmatpush.bf16.msrb.mxu2 %v689_v18 }
  0x3b   :  { %498 = vmatpush.bf16.msrb.mxu3 %v721_v9 }
  0x3e   :  { %485 = vmatpush.bf16.msrb.mxu2 %v685_v24 }
  0x3f   :  { %499 = vmatpush.bf16.msrb.mxu3 %v717_v15 }
  0x42   :  { %486 = vmatpush.bf16.msrb.mxu2 %v681_v30 }
  0x43   :  { %500 = vmatpush.bf16.msrb.mxu3 %v713_v21 }
  0x46   :  { %487 = vmatpush.bf16.msrb.mxu2 %v677_v33 }
  0x47   :  { %501 = vmatpush.bf16.msrb.mxu3 %v709_v27 }
  0x8c   :  { %v65_v58 = vpop.f32.mrf.mxu0 }
  0x8d   :  { %v84_v62 = vmax.f32 %v65_v58, 0.0 }
  0x8e   :  { %v79_v59 = vpop.f32.mrf.mxu1 }
  0x8f   :  { %v85_v63 = vmax.f32 %v79_v59, 0.0 }
  0x94   :  { %v67_v60 = vpop.f32.mrf.mxu0 }
  0x95   :  { %v86_v0 = vmax.f32 %v67_v60, 0.0 }
  0x96   :  { %v81_v61 = vpop.f32.mrf.mxu1 }
  0x97   :  { %v87_v1 = vmax.f32 %v81_v61, 0.0  ;;  %v123_v2 = vpack.c.bf16 %v86_v0, %v84_v62  ;;  %v379_v61 = vld [vmem:[#allocation2 + $0x188] sm:$0x1] }
  0x98   :  { %v380_v62 = vunpack.c.l.bf16 %v379_v61 }
  0x99   :  { %v124_v3 = vpack.c.bf16 %v87_v1, %v85_v63  ;;  %295 = vmatmul.bf16.vlgmr.msra.gmra.mxu2 %v123_v2  ;;  %323 = vmatmul.bf16.vlgmr.msrb.gmra.mxu0 %v123_v2 }
  0x9a   :  { %v383_v63 = vperm.slane %v380_v62, 0 }
  0x9b   :  { %309 = vmatmul.bf16.vlgmr.msra.gmra.mxu3 %v124_v3  ;;  %337 = vmatmul.bf16.vlgmr.msrb.gmra.mxu1 %v124_v3  ;;  %v508_v3 = vlaneseq }
  0x9d   :  { %v509_v5 = vand.u32 127, %v508_v3 }
  0x9f   :  { %vm510_vm2 = vcmp.lt.s32.totalorder %v509_v5, 2 }
 0x116   :  { %v324_v36 = vpop.f32.mrf.mxu0 }
 0x117   :  { %v325_v40 = vadd.f32 %v324_v36, %v126_v38 }
 0x118   :  { %v338_v37 = vpop.f32.mrf.mxu1 }
 0x119   :  { %v339_v45 = vadd.f32 %v338_v37, %v325_v40 }
 0x11b   :  { %v344_v50 = vmax.f32 %v339_v45, 0.0 }
 0x11c   :  { %v296_v41 = vpop.f32.mrf.mxu2 }
 0x11d   :  { %v297_v47 = vadd.f32 %v296_v41, %v125_v43 }
 0x11e   :  { %v310_v42 = vpop.f32.mrf.mxu3  ;;  %v326_v44 = vpop.f32.mrf.mxu0 }
 0x11f   :  { %v327_v46 = vadd.f32 %v326_v44, %v126_v38  ;;  %v311_v53 = vadd.f32 %v310_v42, %v297_v47 }
 0x120   :  { %v340_v48 = vpop.f32.mrf.mxu1 }
 0x121   :  { %v341_v49 = vadd.f32 %v340_v48, %v327_v46  ;;  %v343_v58 = vmax.f32 %v311_v53, 0.0 }
 0x123   :  { %v346_v51 = vmax.f32 %v341_v49, 0.0 }
 0x124   :  { %v298_v52 = vpop.f32.mrf.mxu2 }
 0x125   :  { %v299_v54 = vadd.f32 %v298_v52, %v125_v43  ;;  %v382_v55 = vpack.c.bf16 %v346_v51, %v344_v50 }
 0x126   :  { %v312_v56 = vpop.f32.mrf.mxu3 }
 0x127   :  { %v313_v57 = vadd.f32 %v312_v56, %v299_v54  ;;  %502 = vmatmul.bf16.vlgmr.msrb.gmra.mxu3 %v382_v55 }
 0x129   :  { %v345_v59 = vmax.f32 %v313_v57, 0.0 }
 0x12b   :  { %v381_v60 = vpack.c.bf16 %v345_v59, %v343_v58 }
 0x12d   :  { %488 = vmatmul.bf16.vlgmr.msrb.gmra.mxu2 %v381_v60 }
 0x1aa   :  { %v503_v0 = vpop.f32.mrf.mxu3 }
 0x1b0   :  { %v489_v1 = vpop.f32.mrf.mxu2 }
 0x1b1   :  { %v490_v2 = vadd.f32 %v489_v1, %v383_v63 }
 0x1b2   :  { %v505_v10 = vpop.f32.mrf.mxu3 }
 0x1b3   :  { %v504_v4 = vadd.f32 %v503_v0, %v490_v2 }
 0x1b5   :  { %793 = vtanh.f32 %v504_v4  ;;  %v513_v6 = vmax.f32 %v504_v4, -20.0 }
 0x1b7   :  { %v515_v9 = vmin.f32 %v513_v6, 2.0 }
 0x1b8   :  { %v491_v7 = vpop.f32.mrf.mxu2 }
 0x1b9   :  { %v492_v8 = vadd.f32 %v491_v7, %v383_v63 }
 0x1bb   :  { %v794_v11 = vpop.eup %793  ;;  %v506_v12 = vadd.f32 %v505_v10, %v492_v8 }
 0x1bc   :  { %v517_v13 = vsel %vm510_vm2, %v794_v11, %v515_v9 }
 0x1bd   :  { %519 = vst [vmem:[#allocation5] sm:$0xff] %v517_v13  ;;  %795 = vtanh.f32 %v506_v12  ;;  %v514_v14 = vmax.f32 %v506_v12, -20.0 }
 0x1bf   :  { %v516_v15 = vmin.f32 %v514_v14, 2.0 }
 0x1c3   :  { %v796_v16 = vpop.eup %795 }
 0x1c4   :  { %v518_v17 = vsel %vm510_vm2, %v796_v16, %v516_v15 }
 0x1c5   :  { %520 = vst [vmem:[#allocation5 + $0x8] sm:$0xff] %v518_v17 }
 0x1c6   :  { %533 = dma.vmem_to_hbm [thread:$0]  %s526_s1, 256, %s528_s24, [#allocation4], %s853_s25, %s853_s25, %s854_s26  }
 0x1c7   :  { %847 = dma.done.wait [#allocation4], 256  }
 0x1c8   :  { %848 = vsyncadd [#allocation4], 4294967040 }
 0x1c9   :  { %538 = vsyncpa [#allocation3], 1 }
 0x1ca   :  { %539 = vsyncpa [#allocation4], 1 }

</bundles_post_ra>
